<compile_context>
chip_gen: v6e
topology: v6e:2x2x1
jax: 0.10.0
libtpu: 0.0.40
codegen_flags: <defaults>
</compile_context>

<pallas_src>
import math
from functools import partial

import jax
import jax.numpy as jnp
from jax.experimental import pallas as pl
from jax.experimental.pallas import tpu as pltpu

_MASK_VALUE = -1e30  # finite "-inf" for padded key columns


def _flash_attn_kernel(q_ref, k_ref, v_ref, o_ref, qs_ref, m_ref, l_ref,
                       acc_ref, *, scale, approx_recip, kv_block, t_valid,
                       need_mask):
    # q_ref : (Hb, C, tq)    native (C, T) layout (q slice of packed qkv)
    # k_ref : (Hb, C, tkv)
    # v_ref : (Hb, C, tkv)
    # o_ref : (Hb, C, tq)    lane-dense output
    # qs_ref: (Hb, C, tq)    pre-scaled q (input dtype), filled once per q tile
    # m_ref : (Hb, 1, tq)    running row max        (f32 scratch)
    # l_ref : (Hb, 1, tq)    running softmax denom  (f32 scratch)
    # acc_ref:(Hb, C, tq)    unnormalized output    (f32 scratch)
    kv = pl.program_id(2)

    @pl.when(kv == 0)
    def _():
        # The q block is resident across the kv axis (its index map ignores
        # the kv grid index): fold the 1/sqrt(ch) scale in exactly once per
        # (batch-block, q-tile) instead of re-multiplying every kv step.
        qs_ref[...] = q_ref[...] * jnp.asarray(scale, dtype=q_ref.dtype)
        m_ref[...] = jnp.full(m_ref.shape, -jnp.inf, dtype=m_ref.dtype)
        l_ref[...] = jnp.zeros(l_ref.shape, dtype=l_ref.dtype)
        acc_ref[...] = jnp.zeros(acc_ref.shape, dtype=acc_ref.dtype)

    # s[h, u, t] = sum_c k[h, c, u] * q[h, c, t]   -> (Hb, tkv, tq)
    # (key axis on sublanes, query axis on lanes: m/l/alpha stay in the same
    #  orientation as the (C, T) accumulator -> no in-kernel transposes.)
    s = jax.lax.dot_general(
        k_ref[...], qs_ref[...], (((1,), (1,)), ((0,), (0,))),
        preferred_element_type=jnp.float32)

    if need_mask:
        # Mask padded key columns (padding only exists past t_valid).
        col = (jax.lax.broadcasted_iota(jnp.int32, (1, kv_block, 1), 1)
               + kv * kv_block)
        s = jnp.where(col < t_valid, s, _MASK_VALUE)

    m_prev = m_ref[...]                                  # (Hb, 1, tq)
    m_cur = jnp.max(s, axis=1, keepdims=True)            # (Hb, 1, tq)
    m_new = jnp.maximum(m_prev, m_cur)
    alpha = jnp.exp(m_prev - m_new)                      # rescale of old state
    p = jnp.exp(s - m_new)                               # (Hb, tkv, tq) f32

    l_ref[...] = alpha * l_ref[...] + jnp.sum(p, axis=1, keepdims=True)
    m_ref[...] = m_new

    # torch casts the softmax weights back to the input dtype before the
    # value matmul (no-op for f32 inputs, bf16 MXU feed otherwise).
    p_in = p.astype(v_ref.dtype)

    # pv[h, c, t] = sum_u v[h, c, u] * p[h, u, t]   -> (Hb, C, tq)
    pv = jax.lax.dot_general(
        v_ref[...], p_in, (((2,), (1,)), ((0,), (0,))),
        preferred_element_type=jnp.float32)

    acc_ref[...] = acc_ref[...] * alpha + pv

    @pl.when(kv == pl.num_programs(2) - 1)
    def _():
        # exact reciprocal for f32 inputs, EUP approx for lower precision
        inv_l = pl.reciprocal(l_ref[...], approx=approx_recip)
        o_ref[...] = (acc_ref[...] * inv_l).astype(o_ref.dtype)


def _vmem_capacity_bytes():
    """Best-effort VMEM capacity query (generation-aware budgeting)."""
    try:
        cap = int(pltpu.get_tpu_info().vmem_capacity_bytes)
        if cap > 0:
            return cap
    except Exception:
        pass
    try:
        kind = jax.devices()[0].device_kind.lower()
    except Exception:
        kind = ""
    if "v5" in kind or "v6" in kind:
        return 128 * 1024 * 1024
    # v7x (64 MiB per TC) and unknown chips: be conservative.
    return 64 * 1024 * 1024


def _pick_tile(t_total, pref):
    """Largest power-of-two multiple of 128 <= pref dividing t_total, else full."""
    if t_total <= pref:
        return t_total
    best = None
    cand = 128
    while cand <= pref:
        if t_total % cand == 0:
            best = cand
        cand *= 2
    return t_total if best is None else best


def _per_head_bytes(tq, tkv, ch, itemsize):
    """VMEM bytes needed per head in one grid step (incl. double-buffering)."""
    b = 2 * tq * tkv * 4                          # s, p (f32)
    if itemsize != 4:
        b += tq * tkv * itemsize                  # p_in cast temp
    b += ch * tq * 4                              # acc scratch (f32)
    b += 2 * tq * 4                               # m, l scratch (f32)
    b += ch * tq * itemsize                       # scaled-q scratch
    b += 2 * (2 * ch * tq + 2 * ch * tkv) * itemsize   # 2x-buffered q,out,k,v
    return b


def _xla_attention(qkv, n_heads):
    """Pure-XLA path, mirrors the PyTorch forward exactly (used for T < 128)."""
    bs, width, length = qkv.shape
    ch = width // (3 * n_heads)
    qkv_r = qkv.reshape(bs * n_heads, 3 * ch, length)
    q, k, v = qkv_r[:, :ch], qkv_r[:, ch:2 * ch], qkv_r[:, 2 * ch:]
    scale = 1.0 / math.sqrt(math.sqrt(ch))
    w = jnp.einsum('bct,bcs->bts', q * scale, k * scale)
    w = jax.nn.softmax(w.astype(jnp.float32), axis=-1).astype(w.dtype)
    a = jnp.einsum('bts,bcs->bct', w, v)
    return a.reshape(bs, -1, length)


def qkv_attention_legacy(qkv, n_heads, *, q_tile=None, kv_tile=None,
                         vmem_block_budget=None):
    """qkv: [N, H*3*C, T] -> [N, H*C, T] (matches QKVAttentionLegacy.forward)."""
    bs, width, length = qkv.shape
    assert width % (3 * n_heads) == 0
    ch = width // (3 * n_heads)
    dtype = qkv.dtype
    itemsize = qkv.dtype.itemsize

    # Tiny sequences: T (the lane dim) < 128 means <=50% lane utilization and
    # masked stores; per-step overhead dominates.  Use plain XLA instead.
    if length < 128:
        return _xla_attention(qkv, n_heads)

    B = bs * n_heads
    T = length
    qkv_r = qkv.reshape(B, 3 * ch, T)              # packed (B, 3C, T)

    # Pad T up to a multiple of 128; padded key columns get masked inside the
    # kernel, padded query columns are sliced off the output.
    T_pad = ((T + 127) // 128) * 128
    need_mask = T_pad != T
    if need_mask:
        qkv_r = jnp.pad(qkv_r, ((0, 0), (0, 0), (0, T_pad - T)))

    scale = 1.0 / math.sqrt(ch)                    # (ch**-0.25)**2 folded into q

    # ---- generation-aware VMEM budgeting -------------------------------
    cap = _vmem_capacity_bytes()
    big_vmem = cap >= 128 * 1024 * 1024            # v5e / v6e
    vmem_limit = 96 * 1024 * 1024 if big_vmem else 44 * 1024 * 1024
    if vmem_block_budget is None:
        vmem_block_budget = (20 if big_vmem else 10) * 1024 * 1024
    if q_tile is None:
        q_tile = 512 if big_vmem else 256          # bigger tq cuts K/V restream
    if kv_tile is None:
        kv_tile = 512

    tq = _pick_tile(T_pad, q_tile)
    tkv = _pick_tile(T_pad, kv_tile)
    # Shrink tiles (kv first -- only tq reduces HBM traffic) until one
    # head-block fits the per-step budget.
    while _per_head_bytes(tq, tkv, ch, itemsize) > vmem_block_budget:
        if tkv >= tq and tkv > 128:
            tkv = _pick_tile(T_pad, tkv // 2)
        elif tq > 128:
            tq = _pick_tile(T_pad, tq // 2)
        else:
            break

    per_head = _per_head_bytes(tq, tkv, ch, itemsize)
    hb = max(1, int(vmem_block_budget // per_head))
    hb = min(hb, B)
    # Keep at least a few parallel grid points so a 2-TensorCore chip (v7x)
    # can split the (batch, q-tile) axes instead of serializing on kv.
    n_q = T_pad // tq
    target = min(4, B * n_q)
    need_b = -(-target // n_q)                     # ceil(target / n_q)
    hb = min(hb, max(1, B // need_b))
    while B % hb:
        hb -= 1

    # dtype-aware packed-buffer alignment: sub-32-bit dtypes pack 16/32 rows
    # per sublane tile, so the ch / 2ch channel offsets into the packed buffer
    # must stay tile-aligned to avoid relayout copies.
    pack_rows = max(8, 32 // itemsize)
    if ch % pack_rows == 0:
        q_in = k_in = v_in = qkv_r                 # zero-copy index mapping
        cq, ck, cv = 0, 1, 2
    else:
        q_in = qkv_r[:, :ch, :]
        k_in = qkv_r[:, ch:2 * ch, :]
        v_in = qkv_r[:, 2 * ch:, :]
        cq = ck = cv = 0

    grid = (B // hb, T_pad // tq, T_pad // tkv)

    kernel = partial(_flash_attn_kernel, scale=scale,
                     approx_recip=(dtype != jnp.float32),
                     kv_block=tkv, t_valid=T, need_mask=need_mask)

    out = pl.pallas_call(
        kernel,
        out_shape=jax.ShapeDtypeStruct((B, ch, T_pad), dtype),
        grid=grid,
        in_specs=[
            pl.BlockSpec((hb, ch, tq), lambda b, i, j, c=cq: (b, c, i)),   # q
            pl.BlockSpec((hb, ch, tkv), lambda b, i, j, c=ck: (b, c, j)),  # k
            pl.BlockSpec((hb, ch, tkv), lambda b, i, j, c=cv: (b, c, j)),  # v
        ],
        out_specs=pl.BlockSpec((hb, ch, tq), lambda b, i, j: (b, 0, i)),
        scratch_shapes=[
            pltpu.VMEM((hb, ch, tq), dtype),         # pre-scaled q
            pltpu.VMEM((hb, 1, tq), jnp.float32),    # running max
            pltpu.VMEM((hb, 1, tq), jnp.float32),    # running denominator
            pltpu.VMEM((hb, ch, tq), jnp.float32),   # output accumulator
        ],
        compiler_params=pltpu.CompilerParams(
            dimension_semantics=("parallel", "parallel", "arbitrary"),
            vmem_limit_bytes=vmem_limit,
        ),
    )(q_in, k_in, v_in)

    if need_mask:
        out = out[:, :, :T]
    return out.reshape(bs, n_heads * ch, T)


def _reference(qkv, n_heads):
    """Pure-JAX reference mirroring the PyTorch forward exactly."""
    return _xla_attention(qkv, n_heads)


if __name__ == "__main__":
    key = jax.random.PRNGKey(0)
    k1, k2, k3, k4 = jax.random.split(key, 4)

    # 1) Tiny T -> XLA fallback path (lane dim < 128).
    N, H, C, T = 2, 2, 8, 64
    qkv_a = jax.random.normal(k1, (N, H * 3 * C, T), dtype=jnp.float32)
    out_a = jax.block_until_ready(qkv_attention_legacy(qkv_a, n_heads=H))
    ref_a = _reference(qkv_a, n_heads=H)
    assert out_a.shape == (N, H * C, T), out_a.shape
    assert jnp.allclose(out_a, ref_a, atol=1e-4, rtol=1e-4), "mismatch (small)"

    # 2) Flash-tiled path: multiple q/kv tiles exercises the online softmax
    #    and the once-per-q-tile scale hoist across kv steps.
    N, H, C, T = 1, 2, 8, 256
    qkv_b = jax.random.normal(k2, (N, H * 3 * C, T), dtype=jnp.float32)
    out_b = jax.block_until_ready(
        qkv_attention_legacy(qkv_b, n_heads=H, q_tile=128, kv_tile=128))
    ref_b = _reference(qkv_b, n_heads=H)
    assert out_b.shape == (N, H * C, T), out_b.shape
    assert jnp.allclose(out_b, ref_b, atol=1e-4, rtol=1e-4), "mismatch (tiled)"

    #    Same input through the default (generation-aware) tiling.
    out_b2 = jax.block_until_ready(qkv_attention_legacy(qkv_b, n_heads=H))
    assert jnp.allclose(out_b2, ref_b, atol=1e-4, rtol=1e-4), "mismatch (default)"

    # 3) T not divisible by 128 -> pad + key-masking path.
    N, H, C, T = 1, 2, 8, 200
    qkv_c = jax.random.normal(k3, (N, H * 3 * C, T), dtype=jnp.float32)
    out_c = jax.block_until_ready(
        qkv_attention_legacy(qkv_c, n_heads=H, q_tile=128, kv_tile=128))
    ref_c = _reference(qkv_c, n_heads=H)
    assert out_c.shape == (N, H * C, T), out_c.shape
    assert jnp.allclose(out_c, ref_c, atol=1e-4, rtol=1e-4), "mismatch (padded)"

    # 4) bf16 packed path (ch % 16 == 0 keeps the zero-copy channel offsets).
    N, H, C, T = 1, 2, 64, 256
    qkv_d = jax.random.normal(k4, (N, H * 3 * C, T),
                              dtype=jnp.float32).astype(jnp.bfloat16)
    out_d = jax.block_until_ready(
        qkv_attention_legacy(qkv_d, n_heads=H, q_tile=128, kv_tile=128))
    ref_d = _reference(qkv_d, n_heads=H)
    assert out_d.shape == (N, H * C, T), out_d.shape
    assert jnp.allclose(out_d.astype(jnp.float32), ref_d.astype(jnp.float32),
                        atol=5e-2, rtol=5e-2), "mismatch (bf16)"

    print("KERNEL_OK")
</pallas_src>

<mosaic_0001>
module attributes {stable_mosaic.version = 11 : i64} {
  func.func @_flash_attn_kernel(%arg0: i32, %arg1: i32, %arg2: i32, %arg3: memref<1x8x128xf32, #tpu.memory_space<vmem>>, %arg4: memref<1x8x128xf32, #tpu.memory_space<vmem>>, %arg5: memref<1x8x128xf32, #tpu.memory_space<vmem>>, %arg6: memref<1x8x128xf32, #tpu.memory_space<vmem>>, %arg7: memref<1x8x128xf32, #tpu.memory_space<vmem>>, %arg8: memref<1x1x128xf32, #tpu.memory_space<vmem>>, %arg9: memref<1x1x128xf32, #tpu.memory_space<vmem>>, %arg10: memref<1x8x128xf32, #tpu.memory_space<vmem>>) attributes {dimension_semantics = [#tpu.dimension_semantics<parallel>, #tpu.dimension_semantics<parallel>, #tpu.dimension_semantics<arbitrary>], iteration_bounds = array<i64: 2, 2, 2>, scalar_prefetch = 0 : i64, scratch_operands = 4 : i64, tpu.core_type = #tpu.core_type<tc>, window_params = [{transform_indices = @transform_0, window_bounds = array<i64: 1, 8, 128>}, {transform_indices = @transform_1, window_bounds = array<i64: 1, 8, 128>}, {transform_indices = @transform_2, window_bounds = array<i64: 1, 8, 128>}, {transform_indices = @transform_3, window_bounds = array<i64: 1, 8, 128>}]} {
    %c0_i32 = arith.constant 0 : i32
    %0 = arith.cmpi eq, %arg2, %c0_i32 : i32
    %1 = arith.extui %0 : i1 to i32
    %c0_i32_0 = arith.constant 0 : i32
    %2 = arith.cmpi ne, %1, %c0_i32_0 : i32
    scf.if %2 {
      %c0_31 = arith.constant 0 : index
      %c0_32 = arith.constant 0 : index
      %c0_33 = arith.constant 0 : index
      %32 = vector.load %arg3[%c0_31, %c0_32, %c0_33] : memref<1x8x128xf32, #tpu.memory_space<vmem>>, vector<1x8x128xf32>
      %cst_34 = arith.constant 0.353553385 : f32
      %33 = vector.broadcast %cst_34 : f32 to vector<1x8x128xf32>
      %34 = arith.mulf %32, %33 : vector<1x8x128xf32>
      %c0_35 = arith.constant 0 : index
      %c0_36 = arith.constant 0 : index
      %c0_37 = arith.constant 0 : index
      %35 = vector.load %arg7[%c0_35, %c0_36, %c0_37] : memref<1x8x128xf32, #tpu.memory_space<vmem>>, vector<1x8x128xf32>
      tpu.vector_store %arg7[%c0_35, %c0_36, %c0_37], %34 {strides = array<i32>} : memref<1x8x128xf32, #tpu.memory_space<vmem>>, vector<1x8x128xf32>,
      %cst_38 = arith.constant 0xFF800000 : f32
      %36 = vector.broadcast %cst_38 : f32 to vector<1x1x128xf32>
      %c0_39 = arith.constant 0 : index
      %c0_40 = arith.constant 0 : index
      %c0_41 = arith.constant 0 : index
      %37 = vector.load %arg8[%c0_39, %c0_40, %c0_41] : memref<1x1x128xf32, #tpu.memory_space<vmem>>, vector<1x1x128xf32>
      tpu.vector_store %arg8[%c0_39, %c0_40, %c0_41], %36 {strides = array<i32>} : memref<1x1x128xf32, #tpu.memory_space<vmem>>, vector<1x1x128xf32>,
      %cst_42 = arith.constant 0.000000e+00 : f32
      %38 = vector.broadcast %cst_42 : f32 to vector<1x1x128xf32>
      %c0_43 = arith.constant 0 : index
      %c0_44 = arith.constant 0 : index
      %c0_45 = arith.constant 0 : index
      %39 = vector.load %arg9[%c0_43, %c0_44, %c0_45] : memref<1x1x128xf32, #tpu.memory_space<vmem>>, vector<1x1x128xf32>
      tpu.vector_store %arg9[%c0_43, %c0_44, %c0_45], %38 {strides = array<i32>} : memref<1x1x128xf32, #tpu.memory_space<vmem>>, vector<1x1x128xf32>,
      %cst_46 = arith.constant 0.000000e+00 : f32
      %40 = vector.broadcast %cst_46 : f32 to vector<1x8x128xf32>
      %c0_47 = arith.constant 0 : index
      %c0_48 = arith.constant 0 : index
      %c0_49 = arith.constant 0 : index
      %41 = vector.load %arg10[%c0_47, %c0_48, %c0_49] : memref<1x8x128xf32, #tpu.memory_space<vmem>>, vector<1x8x128xf32>
      tpu.vector_store %arg10[%c0_47, %c0_48, %c0_49], %40 {strides = array<i32>} : memref<1x8x128xf32, #tpu.memory_space<vmem>>, vector<1x8x128xf32>,
    } else {
    }
    %c0 = arith.constant 0 : index
    %c0_1 = arith.constant 0 : index
    %c0_2 = arith.constant 0 : index
    %3 = vector.load %arg4[%c0, %c0_1, %c0_2] : memref<1x8x128xf32, #tpu.memory_space<vmem>>, vector<1x8x128xf32>
    %c0_3 = arith.constant 0 : index
    %c0_4 = arith.constant 0 : index
    %c0_5 = arith.constant 0 : index
    %4 = vector.load %arg7[%c0_3, %c0_4, %c0_5] : memref<1x8x128xf32, #tpu.memory_space<vmem>>, vector<1x8x128xf32>
    %cst = arith.constant dense<0.000000e+00> : vector<1x128x128xf32>
    %5 = tpu.matmul %3, %4, %cst {dimension_numbers = #tpu.dot_dimension_numbers<[1], [1], [2], [2], [0, 0, 0, 2, 1, 2], [0], [0]>} : vector<1x8x128xf32>, vector<1x8x128xf32>, vector<1x128x128xf32> -> vector<1x128x128xf32>
    %c0_6 = arith.constant 0 : index
    %c0_7 = arith.constant 0 : index
    %c0_8 = arith.constant 0 : index
    %6 = vector.load %arg8[%c0_6, %c0_7, %c0_8] : memref<1x1x128xf32, #tpu.memory_space<vmem>>, vector<1x1x128xf32>
    %cst_9 = arith.constant dense<0xFF800000> : vector<1x128xf32>
    %7 = vector.multi_reduction <maximumf>, %5, %cst_9 [1] : vector<1x128x128xf32> to vector<1x128xf32>
    %8 = vector.shape_cast %7 : vector<1x128xf32> to vector<1x1x128xf32>
    %9 = arith.maximumf %6, %8 : vector<1x1x128xf32>
    %10 = arith.subf %6, %9 : vector<1x1x128xf32>
    %11 = math.exp %10 : vector<1x1x128xf32>
    %12 = vector.broadcast %9 : vector<1x1x128xf32> to vector<1x128x128xf32>
    %13 = arith.subf %5, %12 : vector<1x128x128xf32>
    %14 = math.exp %13 : vector<1x128x128xf32>
    %c0_10 = arith.constant 0 : index
    %c0_11 = arith.constant 0 : index
    %c0_12 = arith.constant 0 : index
    %15 = vector.load %arg9[%c0_10, %c0_11, %c0_12] : memref<1x1x128xf32, #tpu.memory_space<vmem>>, vector<1x1x128xf32>
    %16 = arith.mulf %11, %15 : vector<1x1x128xf32>
    %cst_13 = arith.constant dense<0.000000e+00> : vector<1x128xf32>
    %17 = vector.multi_reduction <add>, %14, %cst_13 [1] : vector<1x128x128xf32> to vector<1x128xf32>
    %18 = vector.shape_cast %17 : vector<1x128xf32> to vector<1x1x128xf32>
    %19 = arith.addf %16, %18 : vector<1x1x128xf32>
    %c0_14 = arith.constant 0 : index
    %c0_15 = arith.constant 0 : index
    %c0_16 = arith.constant 0 : index
    %20 = vector.load %arg9[%c0_14, %c0_15, %c0_16] : memref<1x1x128xf32, #tpu.memory_space<vmem>>, vector<1x1x128xf32>
    tpu.vector_store %arg9[%c0_14, %c0_15, %c0_16], %19 {strides = array<i32>} : memref<1x1x128xf32, #tpu.memory_space<vmem>>, vector<1x1x128xf32>,
    %c0_17 = arith.constant 0 : index
    %c0_18 = arith.constant 0 : index
    %c0_19 = arith.constant 0 : index
    %21 = vector.load %arg8[%c0_17, %c0_18, %c0_19] : memref<1x1x128xf32, #tpu.memory_space<vmem>>, vector<1x1x128xf32>
    tpu.vector_store %arg8[%c0_17, %c0_18, %c0_19], %9 {strides = array<i32>} : memref<1x1x128xf32, #tpu.memory_space<vmem>>, vector<1x1x128xf32>,
    %c0_20 = arith.constant 0 : index
    %c0_21 = arith.constant 0 : index
    %c0_22 = arith.constant 0 : index
    %22 = vector.load %arg5[%c0_20, %c0_21, %c0_22] : memref<1x8x128xf32, #tpu.memory_space<vmem>>, vector<1x8x128xf32>
    %cst_23 = arith.constant dense<0.000000e+00> : vector<1x8x128xf32>
    %23 = tpu.matmul %22, %14, %cst_23 {dimension_numbers = #tpu.dot_dimension_numbers<[2], [1], [1], [2], [0, 0, 0, 1, 1, 2], [0], [0]>} : vector<1x8x128xf32>, vector<1x128x128xf32>, vector<1x8x128xf32> -> vector<1x8x128xf32>
    %c0_24 = arith.constant 0 : index
    %c0_25 = arith.constant 0 : index
    %c0_26 = arith.constant 0 : index
    %24 = vector.load %arg10[%c0_24, %c0_25, %c0_26] : memref<1x8x128xf32, #tpu.memory_space<vmem>>, vector<1x8x128xf32>
    %25 = vector.broadcast %11 : vector<1x1x128xf32> to vector<1x8x128xf32>
    %26 = arith.mulf %24, %25 : vector<1x8x128xf32>
    %27 = arith.addf %26, %23 : vector<1x8x128xf32>
    %c0_27 = arith.constant 0 : index
    %c0_28 = arith.constant 0 : index
    %c0_29 = arith.constant 0 : index
    %28 = vector.load %arg10[%c0_27, %c0_28, %c0_29] : memref<1x8x128xf32, #tpu.memory_space<vmem>>, vector<1x8x128xf32>
    tpu.vector_store %arg10[%c0_27, %c0_28, %c0_29], %27 {strides = array<i32>} : memref<1x8x128xf32, #tpu.memory_space<vmem>>, vector<1x8x128xf32>,
    %c1_i32 = arith.constant 1 : i32
    %29 = arith.cmpi eq, %arg2, %c1_i32 : i32
    %30 = arith.extui %29 : i1 to i32
    %c0_i32_30 = arith.constant 0 : i32
    %31 = arith.cmpi ne, %30, %c0_i32_30 : i32
    scf.if %31 {
      %c0_31 = arith.constant 0 : index
      %c0_32 = arith.constant 0 : index
      %c0_33 = arith.constant 0 : index
      %32 = vector.load %arg9[%c0_31, %c0_32, %c0_33] : memref<1x1x128xf32, #tpu.memory_space<vmem>>, vector<1x1x128xf32>
      %33 = tpu.reciprocal %32 : vector<1x1x128xf32> -> vector<1x1x128xf32>
      %c0_34 = arith.constant 0 : index
      %c0_35 = arith.constant 0 : index
      %c0_36 = arith.constant 0 : index
      %34 = vector.load %arg10[%c0_34, %c0_35, %c0_36] : memref<1x8x128xf32, #tpu.memory_space<vmem>>, vector<1x8x128xf32>
      %35 = vector.broadcast %33 : vector<1x1x128xf32> to vector<1x8x128xf32>
      %36 = arith.mulf %34, %35 : vector<1x8x128xf32>
      %c0_37 = arith.constant 0 : index
      %c0_38 = arith.constant 0 : index
      %c0_39 = arith.constant 0 : index
      %37 = vector.load %arg6[%c0_37, %c0_38, %c0_39] : memref<1x8x128xf32, #tpu.memory_space<vmem>>, vector<1x8x128xf32>
      tpu.vector_store %arg6[%c0_37, %c0_38, %c0_39], %36 {strides = array<i32>} : memref<1x8x128xf32, #tpu.memory_space<vmem>>, vector<1x8x128xf32>,
    } else {
    }
    return
  }
  func.func @transform_0(%arg0: i32, %arg1: i32, %arg2: i32) -> (i32, i32, i32) {
    %c0_i32 = arith.constant 0 : i32
    %c0_i32_0 = arith.constant 0 : i32
    return %arg0, %c0_i32, %arg1 : i32, i32, i32
  }
  func.func @transform_1(%arg0: i32, %arg1: i32, %arg2: i32) -> (i32, i32, i32) {
    %c1_i32 = arith.constant 1 : i32
    %c0_i32 = arith.constant 0 : i32
    return %arg0, %c1_i32, %arg2 : i32, i32, i32
  }
  func.func @transform_2(%arg0: i32, %arg1: i32, %arg2: i32) -> (i32, i32, i32) {
    %c2_i32 = arith.constant 2 : i32
    %c0_i32 = arith.constant 0 : i32
    return %arg0, %c2_i32, %arg2 : i32, i32, i32
  }
  func.func @transform_3(%arg0: i32, %arg1: i32, %arg2: i32) -> (i32, i32, i32) {
    %c0_i32 = arith.constant 0 : i32
    %c0_i32_0 = arith.constant 0 : i32
    return %arg0, %c0_i32, %arg1 : i32, i32, i32
  }
}

</mosaic_0001>

<bundles_post_ra>
// kernel: tpu_custom_call.1
= control target key start
LH: loop header
LB: loop body
LE: loop exit
PB: predicated region body
PF: predicated region fallthrough
CT: control target
= control target key end

     0   :  { %s1863_s0 = inlined_call_operand.hbm [shape: f32[2,24,256], index: 0, kind: input, shape index: {}]   ;;  %s1864_s1 = inlined_call_operand.hbm [shape: f32[2,24,256], index: 1, kind: input, shape index: {}]   ;;  %s1865_s2 = inlined_call_operand.hbm [shape: f32[2,24,256], index: 2, kind: input, shape index: {}]   ;;  %s1866_s3 = inlined_call_operand.hbm [shape: f32[2,8,256], index: 3, kind: output, shape index: {}]  }
   0x1   :  { %1886 = sst [smem:[#allocation30_spill]] %s1864_s1 }
   0x2   :  { %1887 = sst [smem:[#allocation31_spill]] %s1865_s2 }
   0x3   :  { %1888 = sst [smem:[#allocation32_spill]] %s1866_s3 }
   0x4   :  { %8 = vsyncpa [#allocation7], 0 }
   0x5   :  { %10 = vsyncpa [#allocation7 + $0x1], 0 }
   0x6   :  { %11 = vsyncpa [#allocation10], 0 }
   0x7   :  { %13 = vsyncpa [#allocation10 + $0x1], 0 }
   0x8   :  { %14 = vsyncpa [#allocation8], 0 }
   0x9   :  { %16 = vsyncpa [#allocation8 + $0x1], 0  ;;  %s1446_s12 = smov 0   ;;  %s1448_s13 = smov 0  }
   0xa   :  { %s1450_s14 = smov 0   ;;  %s1452_s15 = smov 0  }
   0xb   :  { %s1454_s16 = smov 0   ;;  %s1456_s17 = smov 0  }
   0xc   :  { %s1458_s18 = smov 0   ;;  %s1460_s19 = smov 0  }
   0xd   :  { %s1462_s20 = smov 0   ;;  %s1464_s21 = smov 0  }
   0xe   :  { %s1466_s22 = smov 0   ;;  %s1468_s23 = smov 0  }
   0xf   :  { %s1470_s24 = smov 0  }
  0x10 LB: > { %1889 = sst [smem:[#allocation16_spill]] %s1372_s13  ;;  %s1510_s25 = sadd.s32 4294967295, %s1416_s24   ;;  %s1416_s24 = sphi %s1470_s24, %s22_s24   ;;  %s1412_s23 = sphi %s1468_s23, %s1950_s23   ;;  %s1408_s22 = sphi %s1466_s22, %s1949_s22   ;;  %s1404_s21 = sphi %s1464_s21, %s1948_s21   ;;  %s1400_s20 = sphi %s1462_s20, %s1947_s20   ;;  %s1396_s19 = sphi %s1460_s19, %s1940_s19   ;;  %s1392_s18 = sphi %s1458_s18, %s1946_s18   ;;  %s1388_s17 = sphi %s1456_s17, %s1945_s17   ;;  %s1384_s16 = sphi %s1454_s16, %s1944_s16   ;;  %s1380_s15 = sphi %s1452_s15, %s1939_s15   ;;  %s1376_s14 = sphi %s1450_s14, %s1943_s14   ;;  %s1372_s13 = sphi %s1448_s13, %s1942_s13   ;;  %s1368_s12 = sphi %s1446_s12, %s1938_s12  }
  0x11   : > { %1890 = sst [smem:[#allocation17_spill]] %s1380_s15  ;;  %s34_s26 = sadd.s32 1, %s1404_s21 }
  0x12   : > { %1891 = sst [smem:[#allocation18_spill]] %s1384_s16  ;;  %p1513_p0 = scmp.ge.s32.totalorder %s34_s26, 2 }
  0x13   : > { %1892 = sst [smem:[#allocation19_spill]] %s1392_s18  ;;  %p58_p1 = scmp.eq.s32.totalorder %s1416_s24, 0 }
  0x14   : > { %1893 = sst [smem:[#allocation20_spill]] %s1396_s19  ;;  %p1869_p2 = scmp.eq.s32.totalorder %s1510_s25, 0 }
  0x15   : > { %1894 = sst [smem:[#allocation21_spill]] %s1400_s20  ;;  %s1952_s26 = smov (%p1513_p0, %s34_s26), 0 }
  0x16   : > { %1895 = sst [smem:[#allocation22_spill]] %s1408_s22  ;;  %p85_p3 = scmp.ne.s32.totalorder %s1376_s14, %s1372_s13 }
  0x17   : > { %1896 = sst [smem:[#allocation23_spill]] %s1510_s25  ;;  %p91_p4 = scmp.ne.s32.totalorder %s1372_s13, %s1368_s12 }
  0x18   : > { %p1532_p5 = por %p85_p3, %p58_p1  ;;  %p1868_p7 = scmp.lt.s32.totalorder %s1416_s24, 8 }
  0x19   : > { %p1538_p6 = por %p91_p4, %p1869_p2  ;;  %s1021_s6 = smul.u32 6, %s1412_s23 }
  0x1a   : > { %s191_s7 = sand.u32 1, %s1416_s24   ;;  %s193_s8 = sand.u32 1, %s1376_s14  }
  0x1b   : > { %s1899_s5 = scalar_select %p1538_p6, 1, 0 }
  0x1c   : > { %s1546_s9 = sshll.u32 %s193_s8, 3  ;;  %s786_s10 = sadd.s32 %s1404_s21, %s1021_s6 }
  0x1d   : > { %1900 = sst [smem:[#allocation24_spill]] %s1899_s5  ;;  %s895_s11 = sshll.u32 %s786_s10, 7 }
  0x1e   : > { %s1901_s1 = sld [smem:[#allocation30_spill]]  ;;  %s195_s28 = scalar_lea.vmem [#allocation9], %s1546_s9 }
  0x1f   : > { %s205_s3 = sshll.u32 %s195_s28, 4  ;;  %p1559_p8 = pnand %p1868_p7, %p1532_p5  ;;  %s206_s3 = int_to_ptr.vmem [resolvable:$true] %s205_s3 }
  0x20   : > { %s1903_s2 = sld [smem:[#allocation31_spill]]  ;;  %p898_p9 = scmp.ge.s32.totalorder %s1416_s24, 1 }
  0x21   : > { %p231_p10 = scmp.lt.s32.totalorder %s1416_s24, 9  ;;  %s1570_s29 = scalar_lea.sflag [#allocation10], %s191_s7 }
  0x22   : > { %p1884_p11 = pneg %p1559_p8  ;;  %s1203_s28 = scalar_lea.vmem %s206_s3, 128 }
  0x23   : > { %p1204_p12 = scmp.ne.s32.totalorder %s206_s3, %s1203_s28 }
  0x24   : > { %s788_s30 = scalar_lea.hbm %s1901_s1, %s895_s11 }
  0x25   : > { %s789_s19 = scalar_lea.hbm %s788_s30, 256  ;;  %p1206_p13 = pnand %p1204_p12, %p1884_p11 }
  0x26   : > { %s1566_s10 = scalar_lea.hbm %s1903_s2, %s895_s11  ;;  %s1418_s30 = smov [#allocation9]  }
  0x27   : > { %p1207_p3 = pneg %p1206_p13  ;;  %s1208_s4 = sshll.u32 %s1418_s30, 4  ;;  %s1209_s4 = int_to_ptr.vmem [resolvable:$false] %s1208_s4 }
  0x28   : > { %s1210_s18 = scalar_lea.vmem %s1209_s4, 256  ;;  %p1211_p4 = scmp.lt.s32.totalorder %s206_s3, %s1209_s4 }
  0x29   : > { %p1212_p5 = scmp.lt.s32.totalorder %s1210_s18, %s1203_s28 }
  0x2b   : > { %p1213_p7 = por %p1212_p5, %p1211_p4 }
  0x2d   : > { %p1214_p2 = pnand %p1213_p7, %p1207_p3 }
  0x2f   : > { %1217 = shalt.err (!%p1214_p2)
}
  0x30   : > { %1036 = dma.hbm_to_vmem [thread:$0]  (!%p1559_p8), %s789_s19, 128, %s206_s3, %s1570_s29  }
  0x31   : > { %p1584_p2 = pnand %p898_p9, %p231_p10  ;;  %s889_s11 = sadd.s32 4294967294, %s1416_s24  }
  0x32   : > { %s37_s12 = sadd.s32 1, %s1408_s22  ;;  %s50_s8 = sadd.s32 1, %s1388_s17 }
  0x33   : > { %s1904_s7 = scalar_select %p1584_p2, 1, 0 }
  0x34   : > { %s1954_s12 = smov (!%p1513_p0, %s37_s12), %s1408_s22  ;;  %p57_p7 = scmp.ne.s32.totalorder %s1388_s17, %s1384_s16 }
  0x35   : > { %1905 = sst [smem:[#allocation25_spill]] %s1904_s7  ;;  %p63_p12 = scmp.ne.s32.totalorder %s1384_s16, %s1380_s15 }
  0x36   : > { %p39_p13 = scmp.ge.s32.totalorder %s1954_s12, 2  ;;  %p145_p3 = scmp.eq.s32.totalorder %s1510_s25, 7 }
  0x37   : > { %p1601_p9 = por %p58_p1, %p57_p7  ;;  %p1907_p10 = scmp.eq.s32.totalorder %s1510_s25, 0 }
  0x38   : > { %s1956_s12 = smov (%p39_p13, %s1954_s12), 0  ;;  %s1911_s27 = sadd.s32 1, %s1412_s23 }
  0x39   : > { %p1610_p4 = por %p1907_p10, %p63_p12  ;;  %1910 = sst [smem:[#allocation27_spill]] %s1956_s12 }
  0x3a   : > { %s1958_s27 = smov (!%p39_p13, %s1911_s27), %s1412_s23  ;;  %s46_s28 = ssub.s32 %s1408_s22, %s1956_s12 }
  0x3b   : > { %s1908_s19 = scalar_select %p1610_p4, 1, 0 }
  0x3c   : > { %p1621_p0 = por %p145_p3, %p57_p7  ;;  %p43_p1 = scmp.ge.s32.totalorder %s1958_s27, 2 }
  0x3d   : > { %1909 = sst [smem:[#allocation26_spill]] %s1908_s19  ;;  %p151_p5 = scmp.eq.s32.totalorder %s889_s11, 7 }
  0x3e   : > { %s1912_s30 = scalar_select %p1621_p0, 1, 0 }
  0x3f   : > { %s171_s4 = sand.u32 1, %s1388_s17   ;;  %s180_s18 = sadd.s32 %s1408_s22, %s1021_s6 }
  0x40   : > { %1913 = sst [smem:[#allocation28_spill]] %s1912_s30  ;;  %s1960_s27 = smov (%p43_p1, %s1958_s27), 0 }
  0x41   : > { %p1634_p13 = por %p151_p5, %p63_p12  ;;  %s45_s2 = ssub.s32 %s1412_s23, %s1960_s27 }
  0x42   : > { %s892_s12 = sshll.u32 %s171_s4, 3  ;;  %s47_s30 = sor.u32 %s46_s28, %s45_s2 }
  0x43   : > { %s1914_s1 = scalar_select %p1634_p13, 1, 0 }
  0x44   : > { %s1916_s5 = ssub.s32 %s1404_s21, %s1952_s26  ;;  %p48_p7 = scmp.eq.s32.totalorder %s47_s30, 0 }
  0x45   : > { %1915 = sst [smem:[#allocation29_spill]] %s1914_s1  ;;  %s75_s11 = sor.u32 %s1916_s5, %s45_s2 }
  0x46   : > { %p76_p3 = scmp.eq.s32.totalorder %s75_s11, 0  ;;  %s893_s6 = sshll.u32 %s180_s18, 7 }
  0x47   : > { %s1644_s22 = scalar_select %p48_p7, %s1388_s17, %s50_s8  }
  0x48   : > { %s1917_s13 = sadd.s32 1, %s1376_s14  ;;  %s182_s16 = scalar_lea.hbm %s1863_s0, %s893_s6 }
  0x49   : > { %s1649_s25 = scalar_select %p76_p3, %s1376_s14, %s1917_s13  }
  0x4a   : > { %s175_s7 = scalar_lea.vmem [#allocation6], %s892_s12  ;;  %p1918_p12 = scmp.lt.s32.totalorder %s1416_s24, 8 }
  0x4b   : > { %s184_s1 = sshll.u32 %s175_s7, 4  ;;  %s797_s2 = scalar_lea.hbm %s1566_s10, 512  ;;  %s185_s1 = int_to_ptr.vmem [resolvable:$true] %s184_s1 }
  0x4c   : > { %p1658_p10 = pnand %p1918_p12, %p1601_p9  ;;  %s216_s5 = scalar_lea.vmem [#allocation11], %s1546_s9 }
  0x4d   : > { %s226_s8 = sshll.u32 %s216_s5, 4  ;;  %s172_s13 = scalar_lea.sflag [#allocation7], %s171_s4  ;;  %s1664_s8 = int_to_ptr.vmem [resolvable:$true] %s226_s8 }
  0x4e   : > { %p1221_p1 = pneg %p1658_p10  ;;  %s1232_s15 = scalar_lea.vmem %s185_s1, 128 }
  0x4f   : > { %p1233_p5 = scmp.ne.s32.totalorder %s185_s1, %s1232_s15  ;;  %s1419_s7 = smov [#allocation6]  }
  0x50   : > { %s1237_s12 = sshll.u32 %s1419_s7, 4  ;;  %s1238_s12 = int_to_ptr.vmem [resolvable:$false] %s1237_s12 }
  0x51   : > { %p1235_p7 = pnand %p1233_p5, %p1221_p1  ;;  %s1239_s3 = scalar_lea.vmem %s1238_s12, 256 }
  0x52   : > { %p1240_p9 = scmp.lt.s32.totalorder %s185_s1, %s1238_s12  ;;  %p1241_p12 = scmp.lt.s32.totalorder %s1239_s3, %s1232_s15 }
  0x53   : > { %p1236_p3 = pneg %p1235_p7 }
  0x54   : > { %p1242_p11 = por %p1241_p12, %p1240_p9 }
  0x56   : > { %p1243_p13 = pnand %p1242_p11, %p1236_p3 }
  0x58   : > { %1246 = shalt.err (!%p1243_p13)
}
  0x59   : > { %1033 = dma.hbm_to_vmem [thread:$0]  (!%p1658_p10), %s182_s16, 128, %s185_s1, %s172_s13  }
  0x5a   : > { %s1260_s9 = scalar_lea.vmem %s1664_s8, 128  ;;  %p1920_p1 = pneg %p1559_p8 }
  0x5b   : > { %p1261_p0 = scmp.ne.s32.totalorder %s1664_s8, %s1260_s9  ;;  %s1420_s19 = smov [#allocation11]  }
  0x5c   : > { %s1265_s30 = sshll.u32 %s1420_s19, 4  ;;  %s1266_s30 = int_to_ptr.vmem [resolvable:$false] %s1265_s30 }
  0x5d   : > { %p1263_p5 = pnand %p1261_p0, %p1920_p1  ;;  %s1267_s4 = scalar_lea.vmem %s1266_s30, 256 }
  0x5e   : > { %p1268_p9 = scmp.lt.s32.totalorder %s1664_s8, %s1266_s30  ;;  %p1269_p11 = scmp.lt.s32.totalorder %s1267_s4, %s1260_s9 }
  0x5f   : > { %p1264_p7 = pneg %p1263_p5 }
  0x60   : > { %p1270_p13 = por %p1269_p11, %p1268_p9 }
  0x62   : > { %p1271_p3 = pnand %p1270_p13, %p1264_p7 }
  0x64   : > { %1274 = shalt.err (!%p1271_p3)
}
  0x65   : > { %1039 = dma.hbm_to_vmem [thread:$0]  (!%p1559_p8), %s797_s2, 128, %s1664_s8, %s1570_s29  }
  0x66   : > { %235 = sbr.rel (%p1584_p2) target bundleno = 846 (0x34e), region = 32  ;;  %s1922_s16 = sld [smem:[#allocation18_spill]] (!%p1584_p2) }
  0x6c   : > { %s1685_s11 = sand.u32 1, %s1922_s16  }
  0x6d   : > { %s899_s6 = sshll.u32 %s1685_s11, 3  ;;  %s238_s28 = scalar_lea.sflag [#allocation7], %s1685_s11 }
  0x6e   : > { %s241_s5 = scalar_lea.vmem [#allocation6], %s899_s6 }
  0x6f   : > { %1355 = dma.done.wait (%p1610_p4), %s238_s28, 128  }
  0x70   : > { %1357 = vsyncadd (%p1610_p4), %s238_s28, 4294967168  ;;  %s1924_s20 = sld [smem:[#allocation23_spill]] }
  0x71   : > { %s1925_s10 = sld [smem:[#allocation16_spill]] }
  0x76   : > { %s246_s2 = sand.u32 1, %s1924_s20  }
  0x77   : > { %s248_s8 = sand.u32 1, %s1925_s10   ;;  %s247_s15 = scalar_lea.sflag [#allocation10], %s246_s2 }
  0x78   : > { %s1695_s13 = sshll.u32 %s248_s8, 3 }
  0x79   : > { %s250_s7 = scalar_lea.vmem [#allocation9], %s1695_s13 }
  0x7a   : > { %1359 = dma.done.wait (%p1538_p6), %s247_s15, 256  }
  0x7b   : > { %1361 = vsyncadd (%p1538_p6), %s247_s15, 4294967040  ;;  %s259_s12 = scalar_lea.vmem [#allocation11], %s1695_s13  ;;  %s1703_s3 = scalar_lea.vmem [#allocation12], %s899_s6 }
  0x7c   : > { %s1927_s9 = sld [smem:[#allocation19_spill]] }
  0x82   : > { %p903_p8 = scmp.ne.s32.totalorder %s1927_s9, 0 }
  0x84   : > { %295 = sbr.rel (%p903_p8) target bundleno = 141 (0x8d), region = 48 }
  0x89   : > { %v296_v0 = vld [vmem:[%s241_s5] sm:$0xff]  ;;  %v1421_v2 = vmov -inf   ;;  %v1422_v3 = vmov 0.0  }
  0x8a   : > { %v297_v1 = vmul.f32 0.35355338, %v296_v0  ;;  %299 = vst [vmem:[#allocation3] sm:$0x1] %v1421_v2  ;;  %300 = vst [vmem:[#allocation4] sm:$0x1] %v1422_v3 }
  0x8b   : > { %301 = vst [vmem:[#allocation5] sm:$0xff] %v1422_v3 }
  0x8c   : > { %298 = vst [vmem:[#allocation2] sm:$0xff] %v297_v1 }
  0x8d PF: > { %v302_v4 = vld [vmem:[%s250_s7] sm:$0xff]  ;;  %vm336_vm0 = vcmask 64512   ;;  %v1423_v22 = vmov 0.0   ;;  %vm1424_vm1 = vmmov 0   ;;  %v557_v56 = vlaneseq  ;;  %s1928_s19 = sld [smem:[#allocation19_spill]] }
  0x8e   : > { %304 = vxpose.xlu0.b32.start.end [1/1] (short) %v302_v4, 128  ;;  %986 = vmatprep.subr.mxu1 %v1423_v22 }
  0x8f   : > { %1018 = vmatprep.mubr.msk.f32.mxu1 %vm1424_vm1, %v1423_v22  ;;  %v558_v59 = vshrl.u32 %v557_v56, 7 }
  0x91   : > { %v530_v61 = vld [vmem:[#allocation3] sm:$0x1]  ;;  %v1745_v63 = vsub.s32 0, %v558_v59 }
  0x93   : > { %v303_v5 = vld [vmem:[#allocation2] sm:$0xff]  ;;  %p920_p6 = scmp.ne.s32.totalorder %s1928_s19, 1 }
  0x94   : > { %960 = vmatprep.subr.mxu0 %v303_v5 }
  0x95   : > { %961 = vmatpush3.msra.mxu0 %v303_v5 }
 0x10a   : > { %v320_v6 = vpop.trf.xlu0 }
 0x10b   : > { %962 = vmatprep.mubr.msk.f32.mxu0 %vm336_vm0, %v320_v6 }
 0x10e   : > { %v321_v7 = vpop.trf.xlu0 }
 0x10f   : > { %963 = vmatmul.mubr.msk.f32.vlgmr.msra.gmra.mxu0 %vm336_vm0, %v321_v7 }
 0x112   : > { %v322_v8 = vpop.trf.xlu0 }
 0x113   : > { %965 = vmatprep.mubr.msk.f32.mxu0 %vm336_vm0, %v322_v8 }
 0x116   : > { %v323_v9 = vpop.trf.xlu0 }
 0x117   : > { %966 = vmatmul.mubr.msk.f32.gmra.mxu0 %vm336_vm0, %v323_v9 }
 0x11a   : > { %v324_v10 = vpop.trf.xlu0 }
 0x11b   : > { %968 = vmatprep.mubr.msk.f32.mxu0 %vm336_vm0, %v324_v10 }
 0x11e   : > { %v325_v11 = vpop.trf.xlu0 }
 0x11f   : > { %969 = vmatmul.mubr.msk.f32.gmra.mxu0 %vm336_vm0, %v325_v11 }
 0x122   : > { %v326_v12 = vpop.trf.xlu0 }
 0x123   : > { %971 = vmatprep.mubr.msk.f32.mxu0 %vm336_vm0, %v326_v12 }
 0x126   : > { %v327_v13 = vpop.trf.xlu0 }
 0x127   : > { %972 = vmatmul.mubr.msk.f32.gmra.mxu0 %vm336_vm0, %v327_v13 }
 0x12a   : > { %v328_v14 = vpop.trf.xlu0 }
 0x12b   : > { %974 = vmatprep.mubr.msk.f32.mxu0 %vm336_vm0, %v328_v14 }
 0x12e   : > { %v329_v15 = vpop.trf.xlu0 }
 0x12f   : > { %975 = vmatmul.mubr.msk.f32.gmra.mxu0 %vm336_vm0, %v329_v15 }
 0x132   : > { %v330_v16 = vpop.trf.xlu0 }
 0x133   : > { %977 = vmatprep.mubr.msk.f32.mxu0 %vm336_vm0, %v330_v16 }
 0x136   : > { %v331_v17 = vpop.trf.xlu0 }
 0x137   : > { %978 = vmatmul.mubr.msk.f32.gmra.mxu0 %vm336_vm0, %v331_v17 }
 0x13a   : > { %v332_v18 = vpop.trf.xlu0 }
 0x13b   : > { %980 = vmatprep.mubr.msk.f32.mxu0 %vm336_vm0, %v332_v18 }
 0x13e   : > { %v333_v19 = vpop.trf.xlu0 }
 0x13f   : > { %981 = vmatmul.mubr.msk.f32.gmra.mxu0 %vm336_vm0, %v333_v19 }
 0x142   : > { %v334_v20 = vpop.trf.xlu0 }
 0x143   : > { %983 = vmatprep.mubr.msk.f32.mxu0 %vm336_vm0, %v334_v20 }
 0x146   : > { %v335_v21 = vpop.trf.xlu0 }
 0x147   : > { %984 = vmatmul.mubr.msk.f32.gmra.mxu0 %vm336_vm0, %v335_v21 }
 0x1cf   : > { %v964_v23 = vpop.f32.mrf.mxu0 }
 0x1d1   : > { %v451_v24 = vpop.f32.mrf.mxu0 }
 0x1d7   : > { %v967_v25 = vpop.f32.mrf.mxu0 }
 0x1d9   : > { %v461_v26 = vpop.f32.mrf.mxu0 }
 0x1df   : > { %v970_v27 = vpop.f32.mrf.mxu0 }
 0x1e0   : > { %v532_v38 = vmax.f32 %v964_v23, %v970_v27 }
 0x1e1   : > { %v471_v28 = vpop.f32.mrf.mxu0 }
 0x1e2   : > { %v531_v36 = vmax.f32 %v451_v24, %v471_v28 }
 0x1e7   : > { %v1724_v29 = vpop.f32.mrf.mxu0 }
 0x1e8   : > { %v534_v39 = vmax.f32 %v967_v25, %v1724_v29 }
 0x1e9   : > { %v481_v30 = vpop.f32.mrf.mxu0 }
 0x1ea   : > { %v533_v40 = vmax.f32 %v461_v26, %v481_v30 }
 0x1ef   : > { %v1726_v31 = vpop.f32.mrf.mxu0 }
 0x1f0   : > { %v536_v43 = vmax.f32 %v532_v38, %v1726_v31 }
 0x1f1   : > { %v1728_v32 = vpop.f32.mrf.mxu0 }
 0x1f2   : > { %v535_v41 = vmax.f32 %v531_v36, %v1728_v32 }
 0x1f7   : > { %v1730_v33 = vpop.f32.mrf.mxu0 }
 0x1f8   : > { %v538_v44 = vmax.f32 %v534_v39, %v1730_v33 }
 0x1f9   : > { %v1732_v34 = vpop.f32.mrf.mxu0 }
 0x1fa   : > { %v537_v45 = vmax.f32 %v533_v40, %v1732_v34 }
 0x1ff   : > { %v1734_v35 = vpop.f32.mrf.mxu0 }
 0x200   : > { %v540_v48 = vmax.f32 %v536_v43, %v1734_v35 }
 0x201   : > { %v1736_v37 = vpop.f32.mrf.mxu0 }
 0x202   : > { %v539_v46 = vmax.f32 %v535_v41, %v1736_v37 }
 0x204   : > { %v543_v51 = vmax.f32 %v539_v46, %v540_v48 }
 0x207   : > { %v985_v42 = vpop.f32.mrf.mxu0 }
 0x208   : > { %v542_v49 = vmax.f32 %v538_v44, %v985_v42 }
 0x209   : > { %v521_v47 = vpop.f32.mrf.mxu0 }
 0x20a   : > { %v541_v50 = vmax.f32 %v537_v45, %v521_v47 }
 0x20c   : > { %v544_v52 = vmax.f32 %v541_v50, %v542_v49 }
 0x20e   : > { %v545_v53 = vmax.f32 %v543_v51, %v544_v52 }
 0x210   : > { %v546_v54 = vrot.slane %v545_v53, 4 }
 0x212   : > { %v547_v55 = vmax.f32 %v545_v53, %v546_v54 }
 0x214   : > { %v548_v57 = vrot.slane %v547_v55, 2 }
 0x216   : > { %v549_v58 = vmax.f32 %v547_v55, %v548_v57 }
 0x218   : > { %v550_v60 = vrot.slane %v549_v58, 1 }
 0x21a   : > { %v551_v62 = vmax.f32 %v549_v58, %v550_v60 }
 0x21c   : > { %v552_v0 = vmax.f32 %v530_v61, %v551_v62 }
 0x21e   : > { %v553_v1 = vsub.f32 %v530_v61, %v552_v0  ;;  %v560_v2 = vrot.slane %v552_v0, %v1745_v63  ;;  %635 = vst [vmem:[#allocation3] sm:$0x1] %v552_v0 }
 0x220   : > { %v554_v3 = vmul.f32 1.442695, %v553_v1  ;;  %v562_v4 = vsub.f32 %v451_v24, %v560_v2  ;;  %v563_v5 = vsub.f32 %v964_v23, %v560_v2  ;;  %v564_v6 = vsub.f32 %v461_v26, %v560_v2 }
 0x221   : > { %v565_v7 = vsub.f32 %v967_v25, %v560_v2  ;;  %v566_v10 = vsub.f32 %v471_v28, %v560_v2  ;;  %v567_v12 = vsub.f32 %v970_v27, %v560_v2  ;;  %v568_v14 = vsub.f32 %v481_v30, %v560_v2 }
 0x222   : > { %1154 = vpow2.f32 %v554_v3  ;;  %v578_v8 = vmul.f32 1.442695, %v562_v4  ;;  %v580_v9 = vmul.f32 1.442695, %v563_v5  ;;  %v582_v11 = vmul.f32 1.442695, %v564_v6 }
 0x223   : > { %v584_v13 = vmul.f32 1.442695, %v565_v7  ;;  %v586_v15 = vmul.f32 1.442695, %v566_v10  ;;  %v569_v16 = vsub.f32 %v1724_v29, %v560_v2  ;;  %v588_v17 = vmul.f32 1.442695, %v567_v12 }
 0x224   : > { %1156 = vpow2.f32 %v578_v8  ;;  %v570_v18 = vsub.f32 %v1728_v32, %v560_v2  ;;  %v590_v19 = vmul.f32 1.442695, %v568_v14  ;;  %v577_v20 = vsub.f32 %v985_v42, %v560_v2 }
 0x225   : > { %1158 = vpow2.f32 %v580_v9  ;;  %v571_v21 = vsub.f32 %v1726_v31, %v560_v2  ;;  %v576_v24 = vsub.f32 %v521_v47, %v560_v2  ;;  %v592_v25 = vmul.f32 1.442695, %v569_v16  ;;  %v636_v16 = vld [vmem:[%s259_s12] sm:$0xff] }
 0x226   : > { %1160 = vpow2.f32 %v582_v11  ;;  %v572_v26 = vsub.f32 %v1732_v34, %v560_v2  ;;  %v594_v27 = vmul.f32 1.442695, %v570_v18  ;;  %v575_v29 = vsub.f32 %v1734_v35, %v560_v2  ;;  %v610_v11 = vld [vmem:[#allocation4] sm:$0x1] }
 0x227   : > { %1162 = vpow2.f32 %v584_v13  ;;  %v608_v30 = vmul.f32 1.442695, %v577_v20  ;;  %v573_v32 = vsub.f32 %v1730_v33, %v560_v2  ;;  %v596_v36 = vmul.f32 1.442695, %v571_v21 }
 0x228   : > { %1164 = vpow2.f32 %v586_v15  ;;  %v574_v31 = vsub.f32 %v1736_v37, %v560_v2  ;;  %v606_v39 = vmul.f32 1.442695, %v576_v24  ;;  %v598_v34 = vmul.f32 1.442695, %v572_v26 }
 0x229   : > { %1166 = vpow2.f32 %v588_v17  ;;  %v604_v41 = vmul.f32 1.442695, %v575_v29  ;;  %v600_v33 = vmul.f32 1.442695, %v573_v32  ;;  %v707_v17 = vld [vmem:[#allocation5] sm:$0xff] }
 0x22a   : > { %1168 = vpow2.f32 %v590_v19  ;;  %v602_v43 = vmul.f32 1.442695, %v574_v31 }
 0x22b   : > { %1170 = vpow2.f32 %v592_v25 }
 0x22c   : > { %1172 = vpow2.f32 %v594_v27 }
 0x22d   : > { %1174 = vpow2.f32 %v608_v30 }
 0x22e   : > { %1176 = vpow2.f32 %v596_v36 }
 0x22f   : > { %v1751_v23 = vpop.eup %1154  ;;  %1178 = vpow2.f32 %v606_v39 }
 0x230   : > { %v712_v28 = vrot.slane %v1751_v23, %v1745_v63  ;;  %1180 = vpow2.f32 %v598_v34  ;;  %v611_v13 = vmul.f32 %v1751_v23, %v610_v11 }
 0x231   : > { %v1758_v38 = vpop.eup %1156  ;;  %1182 = vpow2.f32 %v604_v41 }
 0x232   : > { %v1761_v40 = vpop.eup %1158  ;;  %1184 = vpow2.f32 %v600_v33  ;;  %v714_v18 = vmul.f32 %v712_v28, %v707_v17 }
 0x233   : > { %v612_v42 = vadd.f32 %v1761_v40, %v1758_v38  ;;  %v1765_v35 = vpop.eup %1160  ;;  %1186 = vpow2.f32 %v602_v43 }
 0x234   : > { %v1163_v37 = vpop.eup %1162 }
 0x235   : > { %v613_v44 = vadd.f32 %v1765_v35, %v612_v42  ;;  %v1165_v46 = vpop.eup %1164 }
 0x236   : > { %v1167_v48 = vpop.eup %1166 }
 0x237   : > { %v614_v45 = vadd.f32 %v1163_v37, %v613_v44  ;;  %v1169_v50 = vpop.eup %1168 }
 0x238   : > { %v1171_v52 = vpop.eup %1170 }
 0x239   : > { %v615_v47 = vadd.f32 %v1165_v46, %v614_v45  ;;  %v1173_v53 = vpop.eup %1172 }
 0x23a   : > { %v1175_v55 = vpop.eup %1174 }
 0x23b   : > { %v616_v49 = vadd.f32 %v1167_v48, %v615_v47  ;;  %v1177_v56 = vpop.eup %1176  ;;  %987 = vmatpush3.msra.mxu1 %v1175_v55 }
 0x23c   : > { %v1179_v58 = vpop.eup %1178  ;;  %988 = vmatprep.subr.mxu1 %v1423_v22 }
 0x23d   : > { %v617_v51 = vadd.f32 %v1169_v50, %v616_v49  ;;  %v1181_v59 = vpop.eup %1180  ;;  %989 = vmatpush3.msra.mxu1 %v1179_v58 }
 0x23e   : > { %v1183_v61 = vpop.eup %1182  ;;  %990 = vmatprep.subr.mxu1 %v1423_v22 }
 0x23f   : > { %v618_v54 = vadd.f32 %v1171_v52, %v617_v51  ;;  %v1185_v62 = vpop.eup %1184  ;;  %991 = vmatpush3.msra.mxu1 %v1183_v61 }
 0x240   : > { %v1187_v1 = vpop.eup %1186  ;;  %992 = vmatprep.subr.mxu1 %v1423_v22 }
 0x241   : > { %v619_v57 = vadd.f32 %v1173_v53, %v618_v54  ;;  %993 = vmatpush3.msra.mxu1 %v1187_v1 }
 0x242   : > { %994 = vmatprep.subr.mxu1 %v1423_v22 }
 0x243   : > { %v620_v60 = vadd.f32 %v1177_v56, %v619_v57  ;;  %995 = vmatpush3.msra.mxu1 %v1185_v62 }
 0x244   : > { %996 = vmatprep.subr.mxu1 %v1423_v22 }
 0x245   : > { %v621_v0 = vadd.f32 %v1181_v59, %v620_v60  ;;  %997 = vmatpush3.msra.mxu1 %v1181_v59 }
 0x246   : > { %998 = vmatprep.subr.mxu1 %v1423_v22 }
 0x247   : > { %v622_v2 = vadd.f32 %v1185_v62, %v621_v0  ;;  %999 = vmatpush3.msra.mxu1 %v1177_v56 }
 0x248   : > { %1000 = vmatprep.subr.mxu1 %v1423_v22 }
 0x249   : > { %v623_v3 = vadd.f32 %v1187_v1, %v622_v2  ;;  %1001 = vmatpush3.msra.mxu1 %v1173_v53 }
 0x24a   : > { %1002 = vmatprep.subr.mxu1 %v1423_v22 }
 0x24b   : > { %v624_v4 = vadd.f32 %v1183_v61, %v623_v3  ;;  %1003 = vmatpush3.msra.mxu1 %v1171_v52 }
 0x24c   : > { %1004 = vmatprep.subr.mxu1 %v1423_v22 }
 0x24d   : > { %v625_v5 = vadd.f32 %v1179_v58, %v624_v4  ;;  %1005 = vmatpush3.msra.mxu1 %v1169_v50 }
 0x24e   : > { %1006 = vmatprep.subr.mxu1 %v1423_v22 }
 0x24f   : > { %v626_v6 = vadd.f32 %v1175_v55, %v625_v5  ;;  %1007 = vmatpush3.msra.mxu1 %v1167_v48 }
 0x250   : > { %1008 = vmatprep.subr.mxu1 %v1423_v22 }
 0x251   : > { %v627_v7 = vrot.slane %v626_v6, 4  ;;  %1009 = vmatpush3.msra.mxu1 %v1165_v46 }
 0x252   : > { %1010 = vmatprep.subr.mxu1 %v1423_v22 }
 0x253   : > { %v628_v8 = vadd.f32 %v627_v7, %v626_v6  ;;  %1011 = vmatpush3.msra.mxu1 %v1163_v37 }
 0x254   : > { %1012 = vmatprep.subr.mxu1 %v1423_v22 }
 0x255   : > { %v629_v9 = vrot.slane %v628_v8, 2  ;;  %1013 = vmatpush3.msra.mxu1 %v1765_v35 }
 0x256   : > { %1014 = vmatprep.subr.mxu1 %v1423_v22 }
 0x257   : > { %v630_v10 = vadd.f32 %v629_v9, %v628_v8  ;;  %1015 = vmatpush3.msra.mxu1 %v1761_v40 }
 0x258   : > { %1016 = vmatprep.subr.mxu1 %v1423_v22 }
 0x259   : > { %v631_v12 = vrot.slane %v630_v10, 1  ;;  %1017 = vmatpush3.msra.mxu1 %v1758_v38 }
 0x25a   : > { %1019 = vmatmul.mubr.f32.vlgmr.msra.gmra.mxu1 %v636_v16 }
 0x25b   : > { %v632_v14 = vadd.f32 %v631_v12, %v630_v10 }
 0x25d   : > { %v633_v15 = vadd.f32 %v632_v14, %v611_v13 }
 0x25f   : > { %634 = vst [vmem:[#allocation4] sm:$0x1] %v633_v15 }
 0x319   : > { %720 = sbr.rel (%p920_p6) target bundleno = 818 (0x332), region = 52 }
 0x31a   : > { %v703_v19 = vpop.f32.mrf.mxu1 }
 0x31b   : > { %v715_v20 = vadd.f32 %v714_v18, %v703_v19 }
 0x31c   : > { %v1020_v21 = vpop.f32.mrf.mxu1 }
 0x31d   : > { %716 = vst [vmem:[#allocation5] sm:$0xff] %v715_v20 }
 0x31e   : > { %v721_v24 = vld [vmem:[#allocation4] sm:$0x1] }
 0x31f   : > { %1188 = vrcp.f32 %v721_v24 }
 0x324   : > { %v723_v25 = vld [vmem:[#allocation5] sm:$0xff] }
 0x32c   : > { %v1189_v22 = vpop.eup %1188 }
 0x32d   : > { %v728_v26 = vrot.slane %v1189_v22, %v1745_v63 }
 0x32f   : > { %v730_v27 = vmul.f32 %v728_v26, %v723_v25 }
 0x331   : > { %731 = vst [vmem:[%s1703_s3] sm:$0xff] %v730_v27 }
 0x332 PF: > { %s1929_s30 = sld [smem:[#allocation21_spill]]  ;;  %s748_s6 = sshll.u32 %s1703_s3, 4  ;;  %s749_s6 = int_to_ptr.vmem [resolvable:$true] %s748_s6 }
 0x333   : > { %s1930_s4 = sld [smem:[#allocation20_spill]]  ;;  %s733_s2 = scalar_lea.sflag [#allocation8], %s1685_s11 }
 0x334   : > { %s1931_s1 = sld [smem:[#allocation28_spill]]  ;;  %s1276_s8 = scalar_lea.vmem %s749_s6, 128 }
 0x335   : > { %s1932_s10 = sld [smem:[#allocation32_spill]]  ;;  %p1277_p2 = scmp.ne.s32.totalorder %s749_s6, %s1276_s8 }
 0x336   : > { %s1425_s13 = smov [#allocation12]  }
 0x337   : > { %s1280_s15 = sshll.u32 %s1425_s13, 4  ;;  %s1281_s15 = int_to_ptr.vmem [resolvable:$false] %s1280_s15 }
 0x338   : > { %s922_s16 = sshll.u32 %s1929_s30, 1  ;;  %s1282_s7 = scalar_lea.vmem %s1281_s15, 256 }
 0x339   : > { %s744_s18 = sadd.s32 %s1930_s4, %s922_s16  ;;  %p1283_p12 = scmp.lt.s32.totalorder %s749_s6, %s1281_s15 }
 0x33a   : > { %s923_s28 = sshll.u32 %s744_s18, 7  ;;  %p1933_p4 = scmp.ne.s32.totalorder %s1931_s1, 0 }
 0x33b   : > { %s746_s29 = scalar_lea.hbm %s1932_s10, %s923_s28  ;;  %p1284_p1 = scmp.lt.s32.totalorder %s1282_s7, %s1276_s8 }
 0x33c   : > { %p1278_p0 = pnand %p1277_p2, %p1933_p4 }
 0x33d   : > { %p1285_p5 = por %p1284_p1, %p1283_p12 }
 0x33e   : > { %p1279_p10 = pneg %p1278_p0 }
 0x340   : > { %p1286_p7 = pnand %p1285_p5, %p1279_p10 }
 0x342   : > { %1289 = shalt.err (!%p1286_p7)
}
 0x343   : > { %s1290_s12 = scalar_lea.hbm %s746_s29, 128  ;;  %s1294_s9 = scalar_lea.hbm %s1932_s10, 512 }
 0x344   : > { %p1291_p9 = scmp.ne.s32.totalorder %s746_s29, %s1290_s12  ;;  %p1295_p3 = scmp.lt.s32.totalorder %s746_s29, %s1932_s10 }
 0x345   : > { %p1296_p8 = scmp.lt.s32.totalorder %s1294_s9, %s1290_s12 }
 0x346   : > { %p1292_p11 = pnand %p1291_p9, %p1933_p4 }
 0x347   : > { %p1297_p6 = por %p1296_p8, %p1295_p3 }
 0x348   : > { %p1293_p13 = pneg %p1292_p11 }
 0x34a   : > { %p1298_p2 = pnand %p1297_p6, %p1293_p13 }
 0x34c   : > { %1301 = shalt.err (!%p1298_p2)
}
 0x34d   : > { %1028 = dma.vmem_to_hbm [thread:$0]  (%p1933_p4), %s749_s6, 128, %s746_s29, %s733_s2  }
 0x34e PF: > { %s1934_s4 = sld [smem:[#allocation17_spill]]  ;;  %p1045_p0 = scmp.ge.s32.totalorder %s1416_s24, 2 }
 0x34f   : > { %s1935_s16 = sld [smem:[#allocation29_spill]] }
 0x354   : > { %s760_s18 = sand.u32 1, %s1934_s4  }
 0x355   : > { %p1936_p10 = scmp.ne.s32.totalorder %s1935_s16, 0  ;;  %s761_s28 = scalar_lea.sflag [#allocation8], %s760_s18 }
 0x357   : > { %p1041_p12 = pnand %p1045_p0, %p1936_p10 }
 0x359   : > { %p1042_p1 = pneg %p1041_p12 }
 0x35b   : > { %1363 = dma.done.wait (%p1042_p1), %s761_s28, 128  }
 0x35c   : > { %1365 = vsyncadd (%p1042_p1), %s761_s28, 4294967168  ;;  %s22_s24 = sadd.s32 1, %s1416_s24   ;;  %s1938_s12 = sld [smem:[#allocation16_spill]] }
 0x35d   : > { %p1819_p5 = scmp.ge.s32.totalorder %s22_s24, 10   ;;  %s1939_s15 = sld [smem:[#allocation18_spill]] }
 0x35e   : > { %s1940_s19 = sld [smem:[#allocation22_spill]]  ;;  %s1942_s13 = smov %s1376_s14 }
 0x35f   : > { %s1941_s1 = sld [smem:[#allocation27_spill]]  ;;  %s1943_s14 = smov %s1649_s25 }
 0x360   : > { %s1944_s16 = smov %s1388_s17  ;;  %s1945_s17 = smov %s1644_s22 }
 0x361   : > { %s1946_s18 = smov %s1404_s21  ;;  %s1947_s20 = smov %s1412_s23 }
 0x362   : > { %s1948_s21 = smov %s1952_s26  ;;  %s1950_s23 = smov %s1960_s27 }
 0x363   :  { %21 = sbr.rel (!%p1819_p5) target bundleno = 16 (0x10), region = 109 }
 0x365   : > { %s1949_s22 = smov %s1941_s1 }
 0x368   :  { %766 = vsyncpa [#allocation7], 1 }
 0x369   :  { %768 = vsyncpa [#allocation7 + $0x1], 1 }
 0x36a   :  { %769 = vsyncpa [#allocation10], 1 }
 0x36b   :  { %771 = vsyncpa [#allocation10 + $0x1], 1 }
 0x36c   :  { %772 = vsyncpa [#allocation8], 1 }
 0x36d   :  { %774 = vsyncpa [#allocation8 + $0x1], 1 }

</bundles_post_ra>
